<compile_context>
chip_gen: v7x
topology: tpu7x:2x2x1
jax: 0.10.0
libtpu: 0.0.40
codegen_flags: <defaults>
</compile_context>

<pallas_src>
import functools

import jax
import jax.numpy as jnp
from jax.experimental import pallas as pl
from jax.experimental.pallas import tpu as pltpu


def _round_up(v, m):
    return ((v + m - 1) // m) * m


def _bce_sum_tile_kernel(x_ref, t_ref, out_ref, *, n_valid_rows, ragged_last):
    """Writes this tile's partial BCE sum into a (1, 1) SMEM output block."""
    tile_rows, lane = x_ref.shape

    x = x_ref[...].astype(jnp.float32)
    t = t_ref[...].astype(jnp.float32)

    # PyTorch clamps the log terms at -100 to avoid -inf.
    log_x = jnp.maximum(jnp.log(x), -100.0)
    log_1mx = jnp.maximum(jnp.log(1.0 - x), -100.0)
    # loss = -(t*log(x) + (1-t)*log(1-x)) rewritten to drop one multiply.
    loss = -(log_1mx + t * (log_x - log_1mx))

    def _partial(v):
        # Fold to (8, lane) with pure VPU adds (reshape stays on (8,128) tile
        # boundaries, so it is layout-free); one small XLU reduce per tile.
        return jnp.sum(v.reshape(tile_rows // 8, 8, lane).sum(axis=0))

    if not ragged_last:
        # Every tile is full: no masking ops traced at all.
        out_ref[0, 0] = _partial(loss)
    else:
        i = pl.program_id(0)
        is_last = i == pl.num_programs(0) - 1

        # Fast path for all full tiles: unmasked accumulate.
        @pl.when(jnp.logical_not(is_last))
        def _():
            out_ref[0, 0] = _partial(loss)

        # Only the single ragged tile pays for iota/compare/select. The mask
        # also covers the BlockSpec block-padding rows, whose garbage may be
        # NaN through the log path (the select discards it). Row-level
        # compare only -> no int32 overflow even for huge inputs.
        @pl.when(is_last)
        def _():
            row = jax.lax.broadcasted_iota(jnp.int32, (tile_rows, lane), 0)
            valid = (i * tile_rows + row) < n_valid_rows
            out_ref[0, 0] = _partial(jnp.where(valid, loss, 0.0))


def bce_loss_sum(x, target, *, tile_rows=2048):
    """Binary cross entropy with reduction='sum' (matches F.binary_cross_entropy)."""
    assert x.shape == target.shape, "Inconsitent dimension!"

    lane = 128
    total = int(x.size)

    xf = x.reshape(-1)
    tf = target.reshape(-1)

    rows = total // lane
    rem = total - rows * lane

    loss = jnp.float32(0.0)

    if rows > 0:
        if rem:
            # Non-128-multiple element count: kernel consumes the 128-aligned
            # prefix; the <128-element tail is handled below with plain XLA
            # ops (no full-tensor pad of x and target).
            # TODO(synk): a fully zero-copy ragged path would need manual DMA
            # from a pl.ANY HBM ref; add it only if a non-aligned size is hot.
            x2 = xf[: rows * lane].reshape(rows, lane)
            t2 = tf[: rows * lane].reshape(rows, lane)
        else:
            x2 = xf.reshape(rows, lane)  # pure bitcast view, no copy
            t2 = tf.reshape(rows, lane)

        # Default 2048 rows = 1 MiB/block/input (f32); 2 inputs x 2 pipeline
        # buffers = 4 MiB -> fits v5e's 16 MiB and v6e/v7x's 32 MiB scoped
        # VMEM defaults with plenty of headroom, and amortizes the per-step
        # overhead on v7x. Sweep 2048-4096 if xprof shows exposed overhead.
        tr = max(8, min(int(tile_rows), _round_up(rows, 8)))
        tr = _round_up(tr, 8)
        n_tiles = pl.cdiv(rows, tr)
        ragged_last = (rows % tr) != 0

        cost = pl.CostEstimate(
            flops=8 * rows * lane,
            transcendentals=2 * rows * lane,
            bytes_accessed=(x2.size * x2.dtype.itemsize
                            + t2.size * t2.dtype.itemsize
                            + 4 * n_tiles),
        )

        kernel = functools.partial(
            _bce_sum_tile_kernel, n_valid_rows=rows, ragged_last=ragged_last)

        partials = pl.pallas_call(
            kernel,
            out_shape=jax.ShapeDtypeStruct((n_tiles, 1), jnp.float32),
            grid=(n_tiles,),
            in_specs=[
                # Inputs stream in their caller dtype; cast to f32 per tile in
                # VMEM (narrow dtypes halve HBM bytes on this mem-bound kernel).
                # TODO(synk): if xprof shows exposed DMA on v7x after the tile
                # bump, try pipeline_mode=pl.Buffered(3) on these two specs.
                pl.BlockSpec((tr, lane), lambda i: (i, 0)),
                pl.BlockSpec((tr, lane), lambda i: (i, 0)),
            ],
            out_specs=pl.BlockSpec(
                (1, 1), lambda i: (i, 0),
                memory_space=pltpu.MemorySpace.SMEM),
            # Independent per-tile partials -> the grid axis is truly parallel:
            # on v7x Mosaic shards it across both TensorCores; no-op on
            # v5e/v6e (single TC).
            compiler_params=pltpu.CompilerParams(
                dimension_semantics=("parallel",)),
            cost_estimate=cost,
        )(x2, t2)

        loss = jnp.sum(partials)

    if rem:
        # <128-element ragged tail: tiny suffix slice + a handful of XLA ops.
        xt = xf[rows * lane:].astype(jnp.float32)
        tt = tf[rows * lane:].astype(jnp.float32)
        log_x = jnp.maximum(jnp.log(xt), -100.0)
        log_1mx = jnp.maximum(jnp.log(1.0 - xt), -100.0)
        loss = loss + jnp.sum(-(tt * log_x + (1.0 - tt) * log_1mx))

    return loss


def bce_loss_sum_ref(x, target):
    # Pure-JAX reference (same clamp semantics as PyTorch).
    xf = x.astype(jnp.float32)
    tf = target.astype(jnp.float32)
    log_x = jnp.maximum(jnp.log(xf), -100.0)
    log_1mx = jnp.maximum(jnp.log(1.0 - xf), -100.0)
    return jnp.sum(-(tf * log_x + (1.0 - tf) * log_1mx))


if __name__ == "__main__":
    key = jax.random.PRNGKey(0)
    k1, k2 = jax.random.split(key)

    # Main case: NCHW, element count a multiple of 128 (zero-copy path).
    shape = (2, 4, 16, 16)
    x = jax.nn.sigmoid(jax.random.normal(k1, shape, dtype=jnp.float32))
    target = jax.random.uniform(k2, shape, dtype=jnp.float32)

    out = jax.block_until_ready(bce_loss_sum(x, target))
    ref = bce_loss_sum_ref(x, target)
    assert jnp.allclose(out, ref, rtol=1e-5, atol=1e-3), (out, ref)

    # Secondary case: non-multiple-of-128 element count, exercising the ragged
    # row-tile mask inside the kernel and the XLA tail path.
    shape2 = (3, 5, 7, 11)
    xb = jax.nn.sigmoid(jax.random.normal(k1, shape2, dtype=jnp.float32))
    tb = jax.random.uniform(k2, shape2, dtype=jnp.float32)
    out2 = jax.block_until_ready(bce_loss_sum(xb, tb))
    ref2 = bce_loss_sum_ref(xb, tb)
    assert jnp.allclose(out2, ref2, rtol=1e-5, atol=1e-3), (out2, ref2)

    print("KERNEL_OK")
</pallas_src>

<mosaic_0001>
module attributes {stable_mosaic.version = 11 : i64} {
  func.func @_bce_sum_tile_kernel(%arg0: i32, %arg1: memref<16x128xf32, #tpu.memory_space<vmem>>, %arg2: memref<16x128xf32, #tpu.memory_space<vmem>>, %arg3: memref<1x1xf32, #tpu.memory_space<smem>>) attributes {dimension_semantics = [#tpu.dimension_semantics<parallel>], iteration_bounds = array<i64: 1>, scalar_prefetch = 0 : i64, scratch_operands = 0 : i64, tpu.core_type = #tpu.core_type<tc>, window_params = [{transform_indices = @transform_0, window_bounds = array<i64: 16, 128>}, {transform_indices = @transform_1, window_bounds = array<i64: 16, 128>}, {transform_indices = @transform_2, window_bounds = array<i64: 1, 1>}]} {
    %c0 = arith.constant 0 : index
    %c0_0 = arith.constant 0 : index
    %0 = vector.load %arg1[%c0, %c0_0] : memref<16x128xf32, #tpu.memory_space<vmem>>, vector<16x128xf32>
    %c0_1 = arith.constant 0 : index
    %c0_2 = arith.constant 0 : index
    %1 = vector.load %arg2[%c0_1, %c0_2] : memref<16x128xf32, #tpu.memory_space<vmem>>, vector<16x128xf32>
    %2 = math.log %0 : vector<16x128xf32>
    %cst = arith.constant -1.000000e+02 : f32
    %3 = vector.broadcast %cst : f32 to vector<16x128xf32>
    %4 = arith.maximumf %2, %3 : vector<16x128xf32>
    %cst_3 = arith.constant 1.000000e+00 : f32
    %5 = vector.broadcast %cst_3 : f32 to vector<16x128xf32>
    %6 = arith.subf %5, %0 : vector<16x128xf32>
    %7 = math.log %6 : vector<16x128xf32>
    %cst_4 = arith.constant -1.000000e+02 : f32
    %8 = vector.broadcast %cst_4 : f32 to vector<16x128xf32>
    %9 = arith.maximumf %7, %8 : vector<16x128xf32>
    %10 = arith.subf %4, %9 : vector<16x128xf32>
    %11 = arith.mulf %1, %10 : vector<16x128xf32>
    %12 = arith.addf %9, %11 : vector<16x128xf32>
    %cst_5 = arith.constant 0.000000e+00 : f32
    %13 = vector.broadcast %cst_5 : f32 to vector<16x128xf32>
    %14 = arith.subf %13, %12 : vector<16x128xf32>
    %15 = vector.shape_cast %14 : vector<16x128xf32> to vector<2x8x128xf32>
    %cst_6 = arith.constant dense<0.000000e+00> : vector<8x128xf32>
    %16 = vector.multi_reduction <add>, %15, %cst_6 [0] : vector<2x8x128xf32> to vector<8x128xf32>
    %17 = vector.shape_cast %16 : vector<8x128xf32> to vector<1x8x128xf32>
    %cst_7 = arith.constant dense<0.000000e+00> : vector<1xf32>
    %18 = vector.multi_reduction <add>, %17, %cst_7 [1, 2] : vector<1x8x128xf32> to vector<1xf32>
    %19 = vector.shape_cast %18 : vector<1xf32> to vector<1x1x1xf32>
    %20 = vector.extract %19[0, 0, 0] : f32 from vector<1x1x1xf32>
    %c0_8 = arith.constant 0 : index
    %c0_9 = arith.constant 0 : index
    %21 = memref.load %arg3[%c0_8, %c0_9] : memref<1x1xf32, #tpu.memory_space<smem>>
    memref.store %20, %arg3[%c0_8, %c0_9] : memref<1x1xf32, #tpu.memory_space<smem>>
    return
  }
  func.func @transform_0(%arg0: i32) -> (i32, i32) {
    %c0_i32 = arith.constant 0 : i32
    %c0_i32_0 = arith.constant 0 : i32
    return %arg0, %c0_i32 : i32, i32
  }
  func.func @transform_1(%arg0: i32) -> (i32, i32) {
    %c0_i32 = arith.constant 0 : i32
    %c0_i32_0 = arith.constant 0 : i32
    return %arg0, %c0_i32 : i32, i32
  }
  func.func @transform_2(%arg0: i32) -> (i32, i32) {
    %c0_i32 = arith.constant 0 : i32
    %c0_i32_0 = arith.constant 0 : i32
    return %arg0, %c0_i32 : i32, i32
  }
}

</mosaic_0001>

<bundles_post_ra>
// kernel: tpu_custom_call.1
= control target key start
LH: loop header
LB: loop body
LE: loop exit
PB: predicated region body
PF: predicated region fallthrough
CT: control target
= control target key end

     0   :  { %7 = vsyncpa [#allocation3], 0  ;;  %s224_s0 = inlined_call_operand.hbm [shape: f32[16,128], index: 0, kind: input, shape index: {}]   ;;  %s225_s1 = inlined_call_operand.hbm [shape: f32[16,128], index: 1, kind: input, shape index: {}]   ;;  %s226_s2 = inlined_call_operand.hbm [shape: f32[1,1], index: 2, kind: output, shape index: {}]  }
   0x1   :  { %8 = vsyncpa [#allocation6], 0 }
   0x2   :  { %9 = vsyncpa [#allocation4], 0  ;;  %s168_s9 = smov [#allocation2]   ;;  %s108_s13 = scalar_lea.hbm %s224_s0, 256 }
   0x3   :  { %s15_s10 = sshll.u32 %s168_s9, 4  ;;  %p109_p0 = scmp.ne.s32.totalorder %s224_s0, %s108_s13  ;;  %s16_s10 = int_to_ptr.vmem [resolvable:$true] %s15_s10 }
   0x4   :  { %p112_p1 = scmp.lt.u32.totalorder %s108_s13, %s224_s0 }
   0x6   :  { %p114_p2 = pnand %p112_p1, %p109_p0 }
   0x8   :  { %117 = shalt.err (!%p114_p2)
}
   0x9   :  { %s118_s18 = scalar_lea.vmem %s16_s10, 256  ;;  %p123_p4 = scmp.lt.s32.totalorder %s16_s10, %s16_s10 }
   0xa   :  { %p119_p3 = scmp.ne.s32.totalorder %s16_s10, %s118_s18  ;;  %p124_p5 = scmp.lt.s32.totalorder %s118_s18, %s118_s18 }
   0xc   :  { %p125_p6 = por %p124_p5, %p123_p4 }
   0xe   :  { %p126_p7 = pnand %p125_p6, %p119_p3 }
  0x10   :  { %129 = shalt.err (!%p126_p7)
}
  0x11   :  { %s169_s19 = smov 128   ;;  %s170_s20 = smov 8  }
  0x12   :  { %21 = dma.hbm_to_vmem [thread:$0]  %s224_s0, 256, %s16_s10, [#allocation3], %s169_s19, %s169_s19, %s170_s20  }
  0x13   :  { %s171_s23 = smov [#allocation5]   ;;  %s130_s27 = scalar_lea.hbm %s225_s1, 256 }
  0x14   :  { %s27_s24 = sshll.u32 %s171_s23, 4  ;;  %p131_p8 = scmp.ne.s32.totalorder %s225_s1, %s130_s27  ;;  %s28_s24 = int_to_ptr.vmem [resolvable:$true] %s27_s24 }
  0x15   :  { %p134_p9 = scmp.lt.u32.totalorder %s130_s27, %s225_s1 }
  0x17   :  { %p136_p10 = pnand %p134_p9, %p131_p8 }
  0x19   :  { %139 = shalt.err (!%p136_p10)
}
  0x1a   :  { %s140_s4 = scalar_lea.vmem %s28_s24, 256  ;;  %p145_p12 = scmp.lt.s32.totalorder %s28_s24, %s28_s24 }
  0x1b   :  { %p141_p11 = scmp.ne.s32.totalorder %s28_s24, %s140_s4  ;;  %p146_p13 = scmp.lt.s32.totalorder %s140_s4, %s140_s4 }
  0x1d   :  { %p147_p0 = por %p146_p13, %p145_p12 }
  0x1f   :  { %p148_p1 = pnand %p147_p0, %p141_p11 }
  0x21   :  { %151 = shalt.err (!%p148_p1)
}
  0x22   :  { %33 = dma.hbm_to_vmem [thread:$0]  %s225_s1, 256, %s28_s24, [#allocation6], %s169_s19, %s169_s19, %s170_s20  }
  0x23   :  { %162 = dma.done.wait [#allocation3], 256  }
  0x24   :  { %163 = vsyncadd [#allocation3], 4294967040 }
  0x25   :  { %164 = dma.done.wait [#allocation6], 256  }
  0x26   :  { %165 = vsyncadd [#allocation6], 4294967040  ;;  %v40_v0 = vld [vmem:[#allocation2] sm:$0xff]  ;;  %v41_v1 = vld [vmem:[#allocation2 + $0x8] sm:$0xff]  ;;  %s152_s8 = scalar_lea.hbm %s226_s2, 16 }
  0x27   :  { %100 = vlog2.f32 %v40_v0  ;;  %v50_v2 = vsub.f32 1.0, %v40_v0  ;;  %v51_v3 = vsub.f32 1.0, %v41_v1  ;;  %v42_v15 = vld [vmem:[#allocation5] sm:$0xff]  ;;  %v43_v17 = vld [vmem:[#allocation5 + $0x8] sm:$0xff]  ;;  %p153_p2 = scmp.ne.s32.totalorder %s226_s2, %s152_s8  ;;  %p156_p3 = scmp.lt.u32.totalorder %s152_s8, %s226_s2 }
  0x28   :  { %102 = vlog2.f32 %v41_v1 }
  0x29   :  { %104 = vlog2.f32 %v50_v2  ;;  %p158_p4 = pnand %p156_p3, %p153_p2 }
  0x2a   :  { %106 = vlog2.f32 %v51_v3 }
  0x31   :  { %v101_v4 = vpop.eup %100 }
  0x32   :  { %v103_v5 = vpop.eup %102  ;;  %v45_v6 = vmul.f32 0.6931472, %v101_v4 }
  0x33   :  { %v105_v7 = vpop.eup %104  ;;  %v47_v8 = vmul.f32 0.6931472, %v103_v5 }
  0x34   :  { %v107_v9 = vpop.eup %106  ;;  %v48_v10 = vmax.f32 %v45_v6, -100.0  ;;  %v53_v11 = vmul.f32 0.6931472, %v105_v7 }
  0x35   :  { %v49_v12 = vmax.f32 %v47_v8, -100.0  ;;  %v55_v13 = vmul.f32 0.6931472, %v107_v9 }
  0x36   :  { %v56_v14 = vmax.f32 %v53_v11, -100.0 }
  0x37   :  { %v57_v16 = vmax.f32 %v55_v13, -100.0 }
  0x38   :  { %v58_v18 = vsub.f32 %v48_v10, %v56_v14 }
  0x39   :  { %v59_v19 = vsub.f32 %v49_v12, %v57_v16 }
  0x3a   :  { %v60_v20 = vmul.f32 %v58_v18, %v42_v15 }
  0x3b   :  { %v61_v21 = vmul.f32 %v59_v19, %v43_v17 }
  0x3c   :  { %v62_v22 = vadd.f32 %v60_v20, %v56_v14 }
  0x3d   :  { %v63_v23 = vadd.f32 %v61_v21, %v57_v16 }
  0x3e   :  { %v64_v24 = vsub.f32 0.0, %v62_v22 }
  0x3f   :  { %v65_v25 = vsub.f32 0.0, %v63_v23 }
  0x41   :  { %v66_v26 = vadd.f32 %v65_v25, %v64_v24 }
  0x43   :  { %67 = vadd.xlane.f32.xlu0 %v66_v26 }
  0xd0   :  { %v68_v27 = vpop.xlane.xlu0 %67 }
  0xd1   :  { %v69_v28 = vrot.slane %v68_v27, 4 }
  0xd3   :  { %v70_v29 = vadd.f32 %v69_v28, %v68_v27 }
  0xd5   :  { %v71_v30 = vrot.slane %v70_v29, 2 }
  0xd7   :  { %v72_v31 = vadd.f32 %v71_v30, %v70_v29 }
  0xd9   :  { %v73_v32 = vrot.slane %v72_v31, 1 }
  0xdb   :  { %v74_v33 = vadd.f32 %v73_v32, %v72_v31 }
  0xdd   :  { %93 = vpush %v74_v33 }
 0x10e   :  { %s94_s1 = spop %93 }
 0x10f   :  { %77 = sst [smem:[#allocation7]] %s94_s1 }
 0x110   :  { %161 = shalt.err (!%p158_p4)
}
 0x111   :  { %s172_s13 = smov [#allocation7]  }
 0x112   :  { %85 = dma.smem_to_hbm %s172_s13, 16, %s226_s2, [#allocation4]  }
 0x113   :  { %166 = dma.done.wait [#allocation4], 16  }
 0x114   :  { %167 = vsyncadd [#allocation4], 4294967280 }
 0x115   :  { %89 = sfence }
 0x116   :  { %90 = vsyncpa [#allocation3], 1 }
 0x117   :  { %91 = vsyncpa [#allocation6], 1 }
 0x118   :  { %92 = vsyncpa [#allocation4], 1 }

</bundles_post_ra>
